<compile_context>
chip_gen: v7x
topology: tpu7x:2x2x1
jax: 0.10.0
libtpu: 0.0.40
codegen_flags: <defaults>
</compile_context>

<pallas_src>
import jax
import jax.numpy as jnp
from jax import lax
from jax.experimental import pallas as pl
from jax.experimental.pallas import tpu as pltpu


def _make_kernel(offsets, pad, T, mm_dtype):
    """offsets: static tuple of tap offsets; pad = max(|offset|)."""

    def kernel(x_ref, mask_ref, w_eff_ref, b1_ref, w2_ref, b2_ref, o_ref):
        xp = x_ref[0]                                   # (C, T + 2*pad), f32
        x_center = xp[:, pad:pad + T]                   # residual path, f32

        # Build the stacked shifted views once -> (nS*C, T); static slices of
        # the padded block, so no boundary masks / zero buffers are needed.
        x_all = jnp.concatenate(
            [xp[:, pad + off: pad + off + T] for off in offsets], axis=0
        ).astype(mm_dtype)
        w_eff = w_eff_ref[...].astype(mm_dtype)         # (C, nS*C)
        w2 = w2_ref[...].astype(mm_dtype)               # (C, C)

        # Fused (dilated convs + concat + first 1x1) -> single wide-K matmul.
        h = jnp.dot(w_eff, x_all, preferred_element_type=jnp.float32)
        h = jnp.maximum(h + b1_ref[...], 0.0)           # folded bias + ReLU (f32)

        out = jnp.dot(w2, h.astype(mm_dtype),
                      preferred_element_type=jnp.float32) + b2_ref[...]

        # TODO(synk): nn.Dropout(0.1) is identity in eval mode; training-mode
        # stochastic dropout is not implemented here.
        o_ref[0] = (x_center + out) * mask_ref[0]

    return kernel


def _fold_params(params, dilation):
    """Fold conv_inc/conv_dec + channel concat + first 1x1 conv into one
    effective (C, C) weight per unique tap offset, and fold the conv biases
    into the first 1x1 bias (exact: the ReLU sits after that bias)."""
    w_inc, b_inc, w_dec, b_dec, w1, b1, w2, b2 = params
    C = w_inc.shape[0]
    d_inc, d_dec = int(dilation[0]), int(dilation[1])
    hp = jax.lax.Precision.HIGHEST           # exact f32 folding on TPU
    w1a = w1[:, :C, 0]                       # acts on the `inc` half of concat
    w1b = w1[:, C:, 0]                       # acts on the `dec` half

    eff = {}
    for k in range(3):                       # Conv1d tap k touches x[t + (k-1)*d]
        for d, half, w in ((d_inc, w1a, w_inc), (d_dec, w1b, w_dec)):
            off = (k - 1) * d
            contrib = jnp.matmul(half, w[:, :, k], precision=hp)   # (C, C)
            eff[off] = contrib if off not in eff else eff[off] + contrib
    offsets = tuple(sorted(eff.keys()))
    w_eff = jnp.concatenate([eff[o] for o in offsets], axis=1)     # (C, nS*C)
    b1f = (b1 + jnp.matmul(w1a, b_inc, precision=hp)
           + jnp.matmul(w1b, b_dec, precision=hp)).reshape(C, 1)
    return offsets, w_eff, b1f, w2[:, :, 0], b2.reshape(C, 1)


def dual_dilated_residual(x, mask, params, dilation, matmul_dtype=jnp.float32):
    """x: (N, C, T), mask: (N, 1, T) -> (N, C, T), all float32.

    The only wrapper-side HBM op on activations is one pad of x by the max
    dilation (replaces the three transposes of the previous version)."""
    N, C, T = x.shape
    offsets, w_eff, b1f, w2m, b2c = _fold_params(params, dilation)
    nS = len(offsets)
    pad = max(abs(o) for o in offsets)                 # == max(dilation)
    x_pad = jnp.pad(x, ((0, 0), (0, 0), (pad, pad)))
    Tp = T + 2 * pad

    kernel = _make_kernel(offsets, pad, T, matmul_dtype)

    cp_kwargs = dict(dimension_semantics=("parallel",))
    # Rough per-step VMEM footprint: double-buffered x_pad / out blocks plus
    # the in-kernel (nS*C, T) and (C, T) temporaries.  Only raise the scoped
    # limit when whole-T blocks get big (long sequences); cap below v7x's
    # 64 MiB physical VMEM.
    est = 4 * (2 * (C * Tp + C * T) + (nS + 3) * C * T)
    if est > 12 * 1024 * 1024:
        cp_kwargs["vmem_limit_bytes"] = min(2 * est, 64 * 1024 * 1024)

    return pl.pallas_call(
        kernel,
        out_shape=jax.ShapeDtypeStruct((N, C, T), jnp.float32),
        grid=(N,),
        in_specs=[
            pl.BlockSpec((1, C, Tp), lambda n: (n, 0, 0)),   # padded x
            pl.BlockSpec((1, 1, T), lambda n: (n, 0, 0)),    # mask
            pl.BlockSpec((C, nS * C), lambda n: (0, 0)),     # fused weight
            pl.BlockSpec((C, 1), lambda n: (0, 0)),          # folded bias 1
            pl.BlockSpec((C, C), lambda n: (0, 0)),          # second 1x1 weight
            pl.BlockSpec((C, 1), lambda n: (0, 0)),          # second 1x1 bias
        ],
        out_specs=pl.BlockSpec((1, C, T), lambda n: (n, 0, 0)),
        compiler_params=pltpu.CompilerParams(**cp_kwargs),
    )(x_pad, mask, w_eff, b1f, w2m, b2c)


def ref_forward(x, mask, params, dilation):
    """Pure-JAX reference with lax convolutions (matches PyTorch semantics)."""
    w_inc, b_inc, w_dec, b_dec, w1, b1, w2, b2 = params
    dn = ("NCH", "OIH", "NCH")

    def conv3(x, w, b, d):
        y = lax.conv_general_dilated(x, w, (1,), [(d, d)],
                                     rhs_dilation=(d,), dimension_numbers=dn)
        return y + b[None, :, None]

    def conv1(x, w, b):
        y = lax.conv_general_dilated(x, w, (1,), [(0, 0)], dimension_numbers=dn)
        return y + b[None, :, None]

    inc = conv3(x, w_inc, b_inc, dilation[0])
    dec = conv3(x, w_dec, b_dec, dilation[1])
    cat = jnp.concatenate([inc, dec], axis=1)
    h = jax.nn.relu(conv1(cat, w1, b1))
    out = conv1(h, w2, b2)
    return (x + out) * mask


if __name__ == "__main__":
    key = jax.random.PRNGKey(0)
    N, C, T = 2, 8, 16            # residual requires in_channels == out_channels
    dilation = (1, 2)
    ks = jax.random.split(key, 10)
    scale = 0.1

    x = jax.random.normal(ks[0], (N, C, T), jnp.float32)
    mask = (jax.random.uniform(ks[1], (N, 1, T)) > 0.2).astype(jnp.float32)

    w_inc = scale * jax.random.normal(ks[2], (C, C, 3), jnp.float32)
    b_inc = scale * jax.random.normal(ks[3], (C,), jnp.float32)
    w_dec = scale * jax.random.normal(ks[4], (C, C, 3), jnp.float32)
    b_dec = scale * jax.random.normal(ks[5], (C,), jnp.float32)
    w1 = scale * jax.random.normal(ks[6], (C, 2 * C, 1), jnp.float32)
    b1 = scale * jax.random.normal(ks[7], (C,), jnp.float32)
    w2 = scale * jax.random.normal(ks[8], (C, C, 1), jnp.float32)
    b2 = scale * jax.random.normal(ks[9], (C,), jnp.float32)
    params = (w_inc, b_inc, w_dec, b_dec, w1, b1, w2, b2)

    ref = ref_forward(x, mask, params, dilation)

    # Default: f32 matmul operands (tight tolerance).
    out = dual_dilated_residual(x, mask, params, dilation)
    out = jax.block_until_ready(out)
    err = float(jnp.max(jnp.abs(out - ref)))
    assert jnp.allclose(out, ref, atol=1e-4, rtol=1e-4), f"f32 max abs err {err}"

    # bf16 matmul operands, f32 accumulation / residual / mask (v6e+ fast path).
    out_bf16 = dual_dilated_residual(x, mask, params, dilation,
                                     matmul_dtype=jnp.bfloat16)
    out_bf16 = jax.block_until_ready(out_bf16)
    err_b = float(jnp.max(jnp.abs(out_bf16 - ref)))
    assert jnp.allclose(out_bf16, ref, atol=2e-2, rtol=2e-2), \
        f"bf16 max abs err {err_b}"

    print("KERNEL_OK")
</pallas_src>

<mosaic_0001>
module attributes {stable_mosaic.version = 11 : i64} {
  func.func @kernel(%arg0: i32, %arg1: memref<1x8x20xf32, #tpu.memory_space<vmem>>, %arg2: memref<1x1x16xf32, #tpu.memory_space<vmem>>, %arg3: memref<8x40xf32, #tpu.memory_space<vmem>>, %arg4: memref<8x1xf32, #tpu.memory_space<vmem>>, %arg5: memref<8x8xf32, #tpu.memory_space<vmem>>, %arg6: memref<8x1xf32, #tpu.memory_space<vmem>>, %arg7: memref<1x8x16xf32, #tpu.memory_space<vmem>>) attributes {dimension_semantics = [#tpu.dimension_semantics<parallel>], iteration_bounds = array<i64: 2>, scalar_prefetch = 0 : i64, scratch_operands = 0 : i64, tpu.core_type = #tpu.core_type<tc>, window_params = [{transform_indices = @transform_0, window_bounds = array<i64: 1, 8, 20>}, {transform_indices = @transform_1, window_bounds = array<i64: 1, 1, 16>}, {pipeline_mode = #tpu.pipeline_mode<synchronous>, transform_indices = @transform_2, window_bounds = array<i64: 8, 40>}, {pipeline_mode = #tpu.pipeline_mode<synchronous>, transform_indices = @transform_3, window_bounds = array<i64: 8, 1>}, {pipeline_mode = #tpu.pipeline_mode<synchronous>, transform_indices = @transform_4, window_bounds = array<i64: 8, 8>}, {pipeline_mode = #tpu.pipeline_mode<synchronous>, transform_indices = @transform_5, window_bounds = array<i64: 8, 1>}, {transform_indices = @transform_6, window_bounds = array<i64: 1, 8, 16>}]} {
    %c0 = arith.constant 0 : index
    %c0_0 = arith.constant 0 : index
    %c0_1 = arith.constant 0 : index
    %0 = vector.load %arg1[%c0, %c0_0, %c0_1] : memref<1x8x20xf32, #tpu.memory_space<vmem>>, vector<1x8x20xf32>
    %1 = vector.shape_cast %0 : vector<1x8x20xf32> to vector<8x20xf32>
    %2 = vector.extract_strided_slice %1 {offsets = [0, 2], sizes = [8, 16], strides = [1, 1]} : vector<8x20xf32> to vector<8x16xf32>
    %3 = vector.extract_strided_slice %1 {offsets = [0, 0], sizes = [8, 16], strides = [1, 1]} : vector<8x20xf32> to vector<8x16xf32>
    %4 = vector.extract_strided_slice %1 {offsets = [0, 1], sizes = [8, 16], strides = [1, 1]} : vector<8x20xf32> to vector<8x16xf32>
    %5 = vector.extract_strided_slice %1 {offsets = [0, 2], sizes = [8, 16], strides = [1, 1]} : vector<8x20xf32> to vector<8x16xf32>
    %6 = vector.extract_strided_slice %1 {offsets = [0, 3], sizes = [8, 16], strides = [1, 1]} : vector<8x20xf32> to vector<8x16xf32>
    %7 = vector.extract_strided_slice %1 {offsets = [0, 4], sizes = [8, 16], strides = [1, 1]} : vector<8x20xf32> to vector<8x16xf32>
    %8 = tpu.concatenate %3, %4, %5, %6, %7 in 0 : vector<8x16xf32>, vector<8x16xf32>, vector<8x16xf32>, vector<8x16xf32>, vector<8x16xf32> -> vector<40x16xf32>
    %c0_2 = arith.constant 0 : index
    %c0_3 = arith.constant 0 : index
    %9 = vector.load %arg3[%c0_2, %c0_3] : memref<8x40xf32, #tpu.memory_space<vmem>>, vector<8x40xf32>
    %c0_4 = arith.constant 0 : index
    %c0_5 = arith.constant 0 : index
    %10 = vector.load %arg5[%c0_4, %c0_5] : memref<8x8xf32, #tpu.memory_space<vmem>>, vector<8x8xf32>
    %cst = arith.constant dense<0.000000e+00> : vector<8x16xf32>
    %11 = tpu.matmul %9, %8, %cst {dimension_numbers = #tpu.dot_dimension_numbers<[1], [0], [0], [1], [0, 0, 1, 1], [], []>} : vector<8x40xf32>, vector<40x16xf32>, vector<8x16xf32> -> vector<8x16xf32>
    %c0_6 = arith.constant 0 : index
    %c0_7 = arith.constant 0 : index
    %12 = vector.load %arg4[%c0_6, %c0_7] : memref<8x1xf32, #tpu.memory_space<vmem>>, vector<8x1xf32>
    %13 = vector.broadcast %12 : vector<8x1xf32> to vector<8x16xf32>
    %14 = arith.addf %11, %13 : vector<8x16xf32>
    %cst_8 = arith.constant 0.000000e+00 : f32
    %15 = vector.broadcast %cst_8 : f32 to vector<8x16xf32>
    %16 = arith.maximumf %14, %15 : vector<8x16xf32>
    %cst_9 = arith.constant dense<0.000000e+00> : vector<8x16xf32>
    %17 = tpu.matmul %10, %16, %cst_9 {dimension_numbers = #tpu.dot_dimension_numbers<[1], [0], [0], [1], [0, 0, 1, 1], [], []>} : vector<8x8xf32>, vector<8x16xf32>, vector<8x16xf32> -> vector<8x16xf32>
    %c0_10 = arith.constant 0 : index
    %c0_11 = arith.constant 0 : index
    %18 = vector.load %arg6[%c0_10, %c0_11] : memref<8x1xf32, #tpu.memory_space<vmem>>, vector<8x1xf32>
    %19 = vector.broadcast %18 : vector<8x1xf32> to vector<8x16xf32>
    %20 = arith.addf %17, %19 : vector<8x16xf32>
    %21 = arith.addf %2, %20 : vector<8x16xf32>
    %c0_12 = arith.constant 0 : index
    %c0_13 = arith.constant 0 : index
    %c0_14 = arith.constant 0 : index
    %22 = vector.load %arg2[%c0_12, %c0_13, %c0_14] : memref<1x1x16xf32, #tpu.memory_space<vmem>>, vector<1x1x16xf32>
    %23 = vector.shape_cast %22 : vector<1x1x16xf32> to vector<1x16xf32>
    %24 = vector.broadcast %23 : vector<1x16xf32> to vector<8x16xf32>
    %25 = arith.mulf %21, %24 : vector<8x16xf32>
    %c0_15 = arith.constant 0 : index
    %c0_16 = arith.constant 0 : index
    %c0_17 = arith.constant 0 : index
    %26 = vector.load %arg7[%c0_15, %c0_16, %c0_17] : memref<1x8x16xf32, #tpu.memory_space<vmem>>, vector<1x8x16xf32>
    %27 = vector.shape_cast %26 : vector<1x8x16xf32> to vector<8x16xf32>
    %28 = vector.shape_cast %25 : vector<8x16xf32> to vector<1x8x16xf32>
    tpu.vector_store %arg7[%c0_15, %c0_16, %c0_17], %28 {strides = array<i32>} : memref<1x8x16xf32, #tpu.memory_space<vmem>>, vector<1x8x16xf32>,
    return
  }
  func.func @transform_0(%arg0: i32) -> (i32, i32, i32) {
    %c0_i32 = arith.constant 0 : i32
    %c0_i32_0 = arith.constant 0 : i32
    %c0_i32_1 = arith.constant 0 : i32
    return %arg0, %c0_i32, %c0_i32_0 : i32, i32, i32
  }
  func.func @transform_1(%arg0: i32) -> (i32, i32, i32) {
    %c0_i32 = arith.constant 0 : i32
    %c0_i32_0 = arith.constant 0 : i32
    %c0_i32_1 = arith.constant 0 : i32
    return %arg0, %c0_i32, %c0_i32_0 : i32, i32, i32
  }
  func.func @transform_2(%arg0: i32) -> (i32, i32) {
    %c0_i32 = arith.constant 0 : i32
    %c0_i32_0 = arith.constant 0 : i32
    %c0_i32_1 = arith.constant 0 : i32
    return %c0_i32, %c0_i32_0 : i32, i32
  }
  func.func @transform_3(%arg0: i32) -> (i32, i32) {
    %c0_i32 = arith.constant 0 : i32
    %c0_i32_0 = arith.constant 0 : i32
    %c0_i32_1 = arith.constant 0 : i32
    return %c0_i32, %c0_i32_0 : i32, i32
  }
  func.func @transform_4(%arg0: i32) -> (i32, i32) {
    %c0_i32 = arith.constant 0 : i32
    %c0_i32_0 = arith.constant 0 : i32
    %c0_i32_1 = arith.constant 0 : i32
    return %c0_i32, %c0_i32_0 : i32, i32
  }
  func.func @transform_5(%arg0: i32) -> (i32, i32) {
    %c0_i32 = arith.constant 0 : i32
    %c0_i32_0 = arith.constant 0 : i32
    %c0_i32_1 = arith.constant 0 : i32
    return %c0_i32, %c0_i32_0 : i32, i32
  }
  func.func @transform_6(%arg0: i32) -> (i32, i32, i32) {
    %c0_i32 = arith.constant 0 : i32
    %c0_i32_0 = arith.constant 0 : i32
    %c0_i32_1 = arith.constant 0 : i32
    return %arg0, %c0_i32, %c0_i32_0 : i32, i32, i32
  }
}

</mosaic_0001>

<bundles_post_ra>
// kernel: tpu_custom_call.1
= control target key start
LH: loop header
LB: loop body
LE: loop exit
PB: predicated region body
PF: predicated region fallthrough
CT: control target
= control target key end

     0   :  { %11 = vsyncpa [#allocation3], 0  ;;  %s1002_s0 = inlined_call_operand.vmem [shape: f32[2,8,20], index: 0, kind: input, shape index: {}]   ;;  %s1003_s1 = inlined_call_operand.hbm [shape: f32[2,1,16], index: 1, kind: input, shape index: {}]   ;;  %s1004_s2 = inlined_call_operand.vmem [shape: f32[8,40], index: 2, kind: input, shape index: {}]   ;;  %s1005_s3 = inlined_call_operand.vmem [shape: f32[8,1], index: 3, kind: input, shape index: {}]   ;;  %s1006_s4 = inlined_call_operand.vmem [shape: f32[8,8], index: 4, kind: input, shape index: {}]   ;;  %s1007_s5 = inlined_call_operand.vmem [shape: f32[8,1], index: 5, kind: input, shape index: {}]   ;;  %s1008_s6 = inlined_call_operand.hbm [shape: f32[2,8,16], index: 6, kind: output, shape index: {}]  }
   0x1   :  { %13 = vsyncpa [#allocation3 + $0x1], 0 }
   0x2   :  { %14 = vsyncpa [#allocation4], 0 }
   0x3   :  { %16 = vsyncpa [#allocation4 + $0x1], 0  ;;  %s819_s21 = smov 0   ;;  %s821_s22 = smov 0  }
   0x4   :  { %s823_s23 = smov 0   ;;  %s825_s24 = smov 0  }
   0x5 LB: > { %s840_s25 = sadd.s32 4294967295, %s771_s24   ;;  %s572_s26 = sadd.s32 4294967294, %s771_s24   ;;  %s771_s24 = sphi %s825_s24, %s1023_s24   ;;  %s767_s23 = sphi %s823_s23, %s1022_s23   ;;  %s763_s22 = sphi %s821_s22, %s1021_s22   ;;  %s759_s21 = sphi %s819_s21, %s1020_s21  }
   0x6   : > { %s844_s27 = sadd.s32 1, %s771_s24   ;;  %s55_s28 = sadd.s32 1, %s767_s23 }
   0x7   : > { %s52_s29 = ssub.s32 %s771_s24, %s844_s27  ;;  %p62_p0 = scmp.ne.s32.totalorder %s767_s23, %s763_s22 }
   0x8   : > { %p53_p1 = scmp.eq.s32.totalorder %s52_s29, 0  ;;  %p63_p2 = scmp.eq.s32.totalorder %s771_s24, 0 }
   0x9   : > { %p68_p3 = scmp.ne.s32.totalorder %s763_s22, %s759_s21  ;;  %p69_p4 = scmp.eq.s32.totalorder %s840_s25, 0 }
   0xa   : > { %s856_s30 = scalar_select %p53_p1, %s767_s23, %s55_s28  }
   0xb   : > { %p858_p5 = por %p63_p2, %p62_p0  ;;  %p862_p6 = por %p69_p4, %p68_p3 }
   0xc   : > { %p176_p7 = scmp.eq.s32.totalorder %s840_s25, 1  ;;  %p182_p8 = scmp.eq.s32.totalorder %s572_s26, 1 }
   0xd   : > { %p630_p10 = scmp.lt.s32.totalorder %s771_s24, 2  ;;  %s221_s11 = sand.u32 1, %s767_s23  }
   0xe   : > { %p869_p11 = por %p176_p7, %p62_p0  ;;  %p873_p12 = por %p182_p8, %p68_p3 }
   0xf   : > { %s575_s12 = sshll.u32 %s771_s24, 4  ;;  %s224_s16 = scalar_lea.vmem [#allocation2], %s221_s11 }
  0x10   : > { %s1012_s9 = scalar_select %p869_p11, 1, 0 }
  0x11   : > { %s1013_s10 = scalar_select %p873_p12, 1, 0 }
  0x12   : > { %s882_s15 = scalar_lea.hbm %s1003_s1, %s575_s12  ;;  %s231_s17 = sshll.u32 %s224_s16, 4  ;;  %s884_s17 = int_to_ptr.vmem [resolvable:$true] %s231_s17 }
  0x13   : > { %p888_p13 = pnand %p630_p10, %p858_p5  ;;  %s222_s19 = scalar_lea.sflag [#allocation3], %s221_s11 }
  0x14   : > { %s675_s20 = scalar_lea.hbm %s882_s15, 16  ;;  %s680_s29 = scalar_lea.hbm %s1003_s1, 32 }
  0x15   : > { %p676_p2 = scmp.ne.s32.totalorder %s882_s15, %s675_s20  ;;  %p677_p3 = pneg %p888_p13 }
  0x16   : > { %p681_p5 = scmp.lt.u32.totalorder %s882_s15, %s1003_s1  ;;  %p682_p8 = scmp.lt.u32.totalorder %s680_s29, %s675_s20 }
  0x17   : > { %p678_p4 = pnand %p677_p3, %p676_p2  ;;  %p684_p9 = scmp.lt.u32.totalorder %s675_s20, %s882_s15 }
  0x18   : > { %p683_p10 = por %p682_p8, %p681_p5 }
  0x19   : > { %p679_p7 = pneg %p678_p4 }
  0x1a   : > { %p685_p0 = por %p684_p9, %p683_p10 }
  0x1c   : > { %p686_p1 = pnand %p685_p0, %p679_p7 }
  0x1e   : > { %689 = shalt.err (!%p686_p1)
}
  0x1f   : > { %s690_s11 = scalar_lea.vmem %s884_s17, 16  ;;  %s773_s13 = smov [#allocation2]  }
  0x20   : > { %p691_p2 = scmp.ne.s32.totalorder %s884_s17, %s690_s11  ;;  %s695_s14 = sshll.u32 %s773_s13, 4  ;;  %s696_s14 = int_to_ptr.vmem [resolvable:$false] %s695_s14 }
  0x21   : > { %s697_s16 = scalar_lea.vmem %s696_s14, 32  ;;  %p698_p11 = scmp.lt.s32.totalorder %s884_s17, %s696_s14 }
  0x22   : > { %p693_p4 = pnand %p691_p2, %p677_p3  ;;  %p699_p5 = scmp.lt.s32.totalorder %s697_s16, %s690_s11 }
  0x24   : > { %p694_p12 = pneg %p693_p4  ;;  %p700_p8 = por %p699_p5, %p698_p11 }
  0x26   : > { %p701_p9 = pnand %p700_p8, %p694_p12 }
  0x28   : > { %704 = shalt.err (!%p701_p9)
}
  0x29   : > { %625 = dma.hbm_to_vmem [thread:$0]  (!%p888_p13), %s882_s15, 16, %s884_s17, %s222_s19  }
  0x2a   : > { %p1015_p0 = scmp.lt.s32.totalorder %s771_s24, 3  ;;  %p1016_p1 = scmp.ge.s32.totalorder %s771_s24, 1 }
  0x2c   : > { %p237_p3 = pnand %p1016_p1, %p1015_p0 }
  0x2d   : > { %s924_s20 = sand.u32 (!%p237_p3), 1, %s763_s22  }
  0x2e   : > { %240 = sbr.rel (%p237_p3) target bundleno = 866 (0x362), region = 44  ;;  %s243_s26 = scalar_lea.sflag (!%p237_p3), [#allocation3], %s924_s20 }
  0x2f   : > { %s245_s28 = scalar_lea.vmem (!%p237_p3), [#allocation2], %s924_s20 }
  0x35   : > { %750 = dma.done.wait (%p862_p6), %s243_s26, 16  }
  0x36   : > { %752 = vsyncadd (%p862_p6), %s243_s26, 4294967280  ;;  %p277_p11 = scmp.lt.s32.totalorder %s840_s25, 1  ;;  %v774_v0 = vmov 0.0|0.0   ;;  %v775_v1 = vmov 0.0   ;;  %vm776_vm0 = vmmov 0   ;;  %v777_v3 = vmov 0  }
  0x37   : > { %612 = vmatprep.subr.bf16.mxu0 %v774_v0  ;;  %607 = vmatprep.subr.mxu1 %v775_v1  ;;  %s778_s8 = smov 127   ;;  %s779_s7 = smov 125   ;;  %v297_v4 = vld [vmem:[%s1005_s3] sm:$0xff]  ;;  %vm303_vm1 = vcmask 326656   ;;  %vm384_vm2 = vcmask 64512   ;;  %vm477_vm3 = vcmask 130048  }
  0x38   : > { %s278_s15 = scalar_select %p277_p11, %s840_s25, 1  ;;  %604 = vmatprep.mubr.msk.f32.mxu0 %vm776_vm0, %v775_v1  ;;  %609 = vmatprep.mubr.msk.f32.mxu1 %vm776_vm0, %v775_v1  ;;  %v295_v11 = vld [vmem:[%s1004_s2] sm:$0xff] }
  0x39   : > { %673 = vset.pattern.permute.xlu0 %v777_v3  ;;  %674 = vset.pattern.permute.xlu1 %v777_v3  ;;  %s780_s12 = smov 126   ;;  %s781_s11 = smov 124   ;;  %v378_v12 = vld [vmem:[%s1007_s5] sm:$0xff] }
  0x3a   : > { %s578_s17 = sshll.u32 %s278_s15, 3  ;;  %v296_v18 = vld [vmem:[%s1006_s4] sm:$0xff]  ;;  %s480_s26 = scalar_lea.sflag [#allocation4], %s924_s20 }
  0x3b   : > { %s280_s29 = scalar_lea.vmem %s1002_s0, %s578_s17  ;;  %v581_v19 = vld [vmem:[%s245_s28] ss:$0 sm:$0xff]  ;;  %p1017_p12 = scmp.ne.s32.totalorder %s1012_s9, 0 }
  0x3c   : > { %v281_v2 = vld [vmem:[%s280_s29] sm:$0xff]  ;;  %s782_s29 = smov 2  }
  0x3d   : > { %283 = vrot.lane.b32.xlu0 %v281_v2, %s778_s8  ;;  %289 = vrot.lane.b32.xlu1 %v281_v2, %s779_s7  ;;  %s577_s8 = sshll.u32 %s924_s20, 3  ;;  %s583_s7 = sshll.u32 %s840_s25, 7 }
  0x3e   : > { %s958_s16 = scalar_lea.hbm %s1008_s6, %s583_s7  ;;  %s783_s25 = smov [#allocation5]  }
  0x41   : > { %286 = vrot.lane.b32.xlu0 %v281_v2, %s780_s12  ;;  %292 = vrot.lane.b32.xlu1 %v281_v2, %s781_s11  ;;  %s276_s11 = scalar_lea.vmem [#allocation5], %s577_s8 }
  0x42   : > { %s493_s13 = sshll.u32 %s276_s11, 4  ;;  %s960_s13 = int_to_ptr.vmem [resolvable:$true] %s493_s13 }
  0x43   : > { %s705_s15 = scalar_lea.vmem %s960_s13, 128 }
  0x44   : > { %p706_p6 = scmp.ne.s32.totalorder %s960_s13, %s705_s15 }
  0x45   : > { %300 = vperm.xlu0 %673, %v297_v4   ;;  %381 = vperm.xlu1 %674, %v378_v12  }
  0x46   : > { %p707_p13 = pnand %p706_p6, %p1017_p12 }
  0x48   : > { %p708_p7 = pneg %p707_p13 }
  0x49   : > { %469 = vrot.lane.b32.xlu0 %v581_v19, %s782_s29 }
  0xaf   : > { %v284_v5 = vpop.permute.xlu0 %283  ;;  %v290_v7 = vpop.permute.xlu1 %289 }
  0xb0   : > { %v613_v6 = vpack.c.bf16 %v284_v5, %v281_v2 }
  0xb2   : > { %614 = vmatpush3.bf16.msra.mxu0 %v613_v6 }
  0xb3   : > { %v287_v8 = vpop.permute.xlu0 %286  ;;  %615 = vmatprep.subr.bf16.mxu0 %v774_v0  ;;  %v293_v10 = vpop.permute.xlu1 %292 }
  0xb4   : > { %v616_v9 = vpack.c.bf16 %v290_v7, %v287_v8 }
  0xb6   : > { %617 = vmatpush3.bf16.msra.mxu0 %v616_v9 }
  0xb7   : > { %602 = vmatprep.subr.mxu0 %v775_v1 }
  0xba   : > { %603 = vmatpush3.msra.mxu0 %v293_v10 }
  0xbb   : > { %605 = vmatmul.mubr.msk.f32.vlgmr.msra.gmra.mrb[0].mxu0 %vm303_vm1, %v295_v11 }
  0xc4   : > { %v301_v13 = vpop.permute.xlu0 %300  ;;  %v382_v20 = vpop.permute.xlu1 %381 }
  0xc8   : > { %v470_v25 = vpop.permute.xlu0 %469 }
 0x18e   : > { %v373_v14 = vpop.f32.mrb[0].mxu0 }
 0x18f   : > { %v374_v15 = vadd.f32 %v373_v14, %v301_v13  ;;  %v606_v16 = vpop.f32.mrb[1].mxu0 }
 0x191   : > { %v377_v17 = vmax.f32 %v374_v15, 0.0 }
 0x193   : > { %608 = vmatpush3.msra.mxu1 %v377_v17 }
 0x194   : > { %610 = vmatmul.mubr.msk.f32.vlgmr.msra.gmra.mrb[0].mxu1 %vm384_vm2, %v296_v18 }
 0x267   : > { %v454_v21 = vpop.f32.mrb[0].mxu1 }
 0x268   : > { %v455_v22 = vadd.f32 %v454_v21, %v382_v20  ;;  %v611_v23 = vpop.f32.mrb[1].mxu1 }
 0x26a   : > { %459 = vrot.lane.b32.xlu1 %v455_v22, %s782_s29 }
 0x2dc   : > { %v460_v24 = vpop.permute.xlu1 %459 }
 0x2dd   : > { %v462_v26 = vadd.f32 %v460_v24, %v281_v2 }
 0x2df   : > { %v472_v27 = vmul.f32 %v470_v25, %v462_v26 }
 0x2e1   : > { %474 = vrot.lane.b32.xlu1 %v472_v27, %s780_s12  ;;  %s709_s12 = sshll.u32 %s783_s25, 4  ;;  %s710_s12 = int_to_ptr.vmem [resolvable:$false] %s709_s12 }
 0x2e2   : > { %s711_s17 = scalar_lea.vmem %s710_s12, 256  ;;  %p712_p10 = scmp.lt.s32.totalorder %s960_s13, %s710_s12 }
 0x2e3   : > { %p713_p2 = scmp.lt.s32.totalorder %s711_s17, %s705_s15 }
 0x2e5   : > { %p714_p4 = por %p713_p2, %p712_p10 }
 0x2e7   : > { %p715_p5 = pnand %p714_p4, %p708_p7 }
 0x353   : > { %v475_v28 = vpop.permute.xlu1 %474 }
 0x354   : > { %478 = vst.msk [vmem:[%s276_s11] sm:$0xff] %vm477_vm3, %v475_v28 }
 0x355   : > { %718 = shalt.err (!%p715_p5)
}
 0x356   : > { %s719_s20 = scalar_lea.hbm %s958_s16, 128  ;;  %s723_s29 = scalar_lea.hbm %s1008_s6, 256 }
 0x357   : > { %p720_p8 = scmp.ne.s32.totalorder %s958_s16, %s719_s20  ;;  %p724_p1 = scmp.lt.u32.totalorder %s958_s16, %s1008_s6 }
 0x358   : > { %p725_p3 = scmp.lt.u32.totalorder %s723_s29, %s719_s20  ;;  %p727_p6 = scmp.lt.u32.totalorder %s719_s20, %s958_s16 }
 0x359   : > { %p721_p9 = pnand %p720_p8, %p1017_p12 }
 0x35a   : > { %p726_p11 = por %p725_p3, %p724_p1 }
 0x35b   : > { %p722_p0 = pneg %p721_p9 }
 0x35c   : > { %p728_p13 = por %p727_p6, %p726_p11 }
 0x35e   : > { %p729_p7 = pnand %p728_p13, %p722_p0 }
 0x360   : > { %732 = shalt.err (!%p729_p7)
}
 0x361   : > { %620 = dma.vmem_to_hbm [thread:$0]  (%p1017_p12), %s960_s13, 128, %s958_s16, %s480_s26  }
 0x362 PF: > { %s505_s11 = sand.u32 1, %s759_s21   ;;  %p1018_p10 = scmp.ne.s32.totalorder %s1013_s10, 0 }
 0x363   : > { %p1019_p2 = scmp.ge.s32.totalorder %s771_s24, 2  ;;  %s506_s28 = scalar_lea.sflag [#allocation4], %s505_s11 }
 0x365   : > { %p627_p4 = pnand %p1019_p2, %p1018_p10 }
 0x367   : > { %754 = dma.done.wait (!%p627_p4), %s506_s28, 128  }
 0x368   : > { %756 = vsyncadd (!%p627_p4), %s506_s28, 4294967168  ;;  %p19_p5 = scmp.ge.s32.totalorder %s844_s27, 4   ;;  %s1020_s21 = smov %s763_s22 }
 0x369   : > { %s1021_s22 = smov %s767_s23  ;;  %s1022_s23 = smov %s856_s30 }
 0x36a   : > { %s1023_s24 = smov %s844_s27  ;;  %21 = sbr.rel (!%p19_p5) target bundleno = 5 (0x5), region = 92 }
 0x371   :  { %511 = vsyncpa [#allocation3], 1 }
 0x372   :  { %513 = vsyncpa [#allocation3 + $0x1], 1 }
 0x373   :  { %514 = vsyncpa [#allocation4], 1 }
 0x374   :  { %516 = vsyncpa [#allocation4 + $0x1], 1 }

</bundles_post_ra>
